<compile_context>
chip_gen: v6e
topology: v6e:2x2x1
jax: 0.10.0
libtpu: 0.0.40
codegen_flags: <defaults>
</compile_context>

<pallas_src>
import jax
import jax.numpy as jnp
from jax.experimental import pallas as pl
from jax.experimental.pallas import tpu as pltpu


def _se_gate_kernel(w_ref, b_ref, v_ref, x_ref, o_ref):
    # w_ref: [TC, Cin]   1x1 conv weight rows for this block (natural layout)
    # b_ref: [TC, 1]     conv bias rows
    # v_ref: [Cin, 1]    squeeze vector (pre-ReLU), replicated across blocks
    # x_ref: [TC, HW]    feature-map rows (NCHW-native, channels on sublanes)
    # o_ref: [TC, HW]
    v = jnp.maximum(v_ref[...].astype(jnp.float32), 0.0)          # ReLU (tiny)
    s = jnp.dot(w_ref[...].astype(jnp.float32), v,
                preferred_element_type=jnp.float32) + b_ref[...]   # 1x1 conv == matvec
    gate = jax.nn.sigmoid(s)                                       # stable sigmoid, EUP exp
    o_ref[...] = (gate * x_ref[...].astype(jnp.float32)).astype(o_ref.dtype)


def se_gate_pallas(x321, x319, weight, bias):
    """x321: [1, Cin, 1, 1], x319: [1, Cout, H, W],
    weight: [Cout, Cin, 1, 1], bias: [Cout] -> [1, Cout, H, W]."""
    n, cin, _, _ = x321.shape
    _, cout, h, w = x319.shape
    assert n == 1
    hw = h * w

    # All of these are free (contiguous) reshapes — no HBM copies.
    v = x321.reshape(cin, 1)             # [Cin, 1]
    wmat = weight.reshape(cout, cin)     # [Cout, Cin], natural orientation (no .T)
    b = bias.reshape(cout, 1)            # [Cout, 1]
    x_flat = x319.reshape(cout, hw)      # [Cout, HW], NCHW-native view

    # Block the Cout dimension: 4 blocks of 144 rows for Cout=576.
    block_cout = 144 if (cout % 144 == 0) else cout
    grid = (cout // block_cout,)

    # TODO(synk): if x319 can be donated by the caller, add
    # input_output_aliases={3: 0} to skip the separate output allocation.
    out_flat = pl.pallas_call(
        _se_gate_kernel,
        out_shape=jax.ShapeDtypeStruct((cout, hw), x319.dtype),
        grid_spec=pltpu.PrefetchScalarGridSpec(
            num_scalar_prefetch=0,
            grid=grid,
            in_specs=[
                pl.BlockSpec((block_cout, cin), lambda i: (i, 0)),  # weight rows
                pl.BlockSpec((block_cout, 1), lambda i: (i, 0)),    # bias rows
                pl.BlockSpec((cin, 1), lambda i: (0, 0)),           # squeeze vector
                pl.BlockSpec((block_cout, hw), lambda i: (i, 0)),   # feature map rows
            ],
            out_specs=pl.BlockSpec((block_cout, hw), lambda i: (i, 0)),
        ),
        compiler_params=pltpu.CompilerParams(
            dimension_semantics=("parallel",)),
    )(wmat, b, v, x_flat)

    return out_flat.reshape(1, cout, h, w)   # free reshape back to NCHW


def se_gate_reference(x321, x319, weight, bias):
    v = jnp.maximum(x321.reshape(1, -1), 0.0)
    s = v @ weight.reshape(weight.shape[0], -1).T + bias[None, :]
    gate = jax.nn.sigmoid(s)                 # [1, Cout]
    return gate[:, :, None, None] * x319


if __name__ == "__main__":
    key = jax.random.PRNGKey(0)
    k1, k2, k3, k4 = jax.random.split(key, 4)

    Cin, Cout, H, W = 144, 576, 14, 14

    x321 = jax.random.normal(k1, (1, Cin, 1, 1), dtype=jnp.float32)
    x319 = jax.random.normal(k2, (1, Cout, H, W), dtype=jnp.float32)

    # Deterministic parameter init (Conv2d(144, 576, kernel_size=1) shapes).
    fan_in = Cin
    bound = 1.0 / (fan_in ** 0.5)
    weight = jax.random.uniform(k3, (Cout, Cin, 1, 1), minval=-bound, maxval=bound,
                                dtype=jnp.float32)
    bias = jax.random.uniform(k4, (Cout,), minval=-bound, maxval=bound,
                              dtype=jnp.float32)

    ref = se_gate_reference(x321, x319, weight, bias)

    out = se_gate_pallas(x321, x319, weight, bias)
    jax.block_until_ready(out)

    assert out.shape == (1, Cout, H, W)
    assert jnp.allclose(out, ref, atol=1e-5, rtol=1e-5)

    print("KERNEL_OK")
</pallas_src>

<mosaic_0001>
module attributes {stable_mosaic.version = 11 : i64} {
  func.func @_se_gate_kernel(%arg0: i32, %arg1: memref<144x144xf32, #tpu.memory_space<vmem>>, %arg2: memref<144x1xf32, #tpu.memory_space<vmem>>, %arg3: memref<144x1xf32, #tpu.memory_space<vmem>>, %arg4: memref<144x196xf32, #tpu.memory_space<vmem>>, %arg5: memref<144x196xf32, #tpu.memory_space<vmem>>) attributes {dimension_semantics = [#tpu.dimension_semantics<parallel>], iteration_bounds = array<i64: 4>, scalar_prefetch = 0 : i64, scratch_operands = 0 : i64, tpu.core_type = #tpu.core_type<tc>, window_params = [{transform_indices = @transform_0, window_bounds = array<i64: 144, 144>}, {transform_indices = @transform_1, window_bounds = array<i64: 144, 1>}, {pipeline_mode = #tpu.pipeline_mode<synchronous>, transform_indices = @transform_2, window_bounds = array<i64: 144, 1>}, {transform_indices = @transform_3, window_bounds = array<i64: 144, 196>}, {transform_indices = @transform_4, window_bounds = array<i64: 144, 196>}]} {
    %c0 = arith.constant 0 : index
    %c0_0 = arith.constant 0 : index
    %0 = vector.load %arg3[%c0, %c0_0] : memref<144x1xf32, #tpu.memory_space<vmem>>, vector<144x1xf32>
    %cst = arith.constant 0.000000e+00 : f32
    %1 = vector.broadcast %cst : f32 to vector<144x1xf32>
    %2 = arith.maximumf %0, %1 : vector<144x1xf32>
    %c0_1 = arith.constant 0 : index
    %c0_2 = arith.constant 0 : index
    %3 = vector.load %arg1[%c0_1, %c0_2] : memref<144x144xf32, #tpu.memory_space<vmem>>, vector<144x144xf32>
    %cst_3 = arith.constant dense<0.000000e+00> : vector<144x1xf32>
    %4 = tpu.matmul %3, %2, %cst_3 {dimension_numbers = #tpu.dot_dimension_numbers<[1], [0], [0], [1], [0, 0, 1, 1], [], []>} : vector<144x144xf32>, vector<144x1xf32>, vector<144x1xf32> -> vector<144x1xf32>
    %c0_4 = arith.constant 0 : index
    %c0_5 = arith.constant 0 : index
    %5 = vector.load %arg2[%c0_4, %c0_5] : memref<144x1xf32, #tpu.memory_space<vmem>>, vector<144x1xf32>
    %6 = arith.addf %4, %5 : vector<144x1xf32>
    %7 = arith.negf %6 : vector<144x1xf32>
    %8 = math.exp %7 : vector<144x1xf32>
    %cst_6 = arith.constant 1.000000e+00 : f32
    %9 = vector.broadcast %cst_6 : f32 to vector<144x1xf32>
    %10 = arith.addf %9, %8 : vector<144x1xf32>
    %11 = arith.divf %9, %10 : vector<144x1xf32>
    %c0_7 = arith.constant 0 : index
    %c0_8 = arith.constant 0 : index
    %12 = vector.load %arg4[%c0_7, %c0_8] : memref<144x196xf32, #tpu.memory_space<vmem>>, vector<144x196xf32>
    %13 = vector.broadcast %11 : vector<144x1xf32> to vector<144x196xf32>
    %14 = arith.mulf %13, %12 : vector<144x196xf32>
    %c0_9 = arith.constant 0 : index
    %c0_10 = arith.constant 0 : index
    %15 = vector.load %arg5[%c0_9, %c0_10] : memref<144x196xf32, #tpu.memory_space<vmem>>, vector<144x196xf32>
    tpu.vector_store %arg5[%c0_9, %c0_10], %14 {strides = array<i32>} : memref<144x196xf32, #tpu.memory_space<vmem>>, vector<144x196xf32>,
    return
  }
  func.func @transform_0(%arg0: i32) -> (i32, i32) {
    %c0_i32 = arith.constant 0 : i32
    %c0_i32_0 = arith.constant 0 : i32
    return %arg0, %c0_i32 : i32, i32
  }
  func.func @transform_1(%arg0: i32) -> (i32, i32) {
    %c0_i32 = arith.constant 0 : i32
    %c0_i32_0 = arith.constant 0 : i32
    return %arg0, %c0_i32 : i32, i32
  }
  func.func @transform_2(%arg0: i32) -> (i32, i32) {
    %c0_i32 = arith.constant 0 : i32
    %c0_i32_0 = arith.constant 0 : i32
    %c0_i32_1 = arith.constant 0 : i32
    return %c0_i32, %c0_i32_0 : i32, i32
  }
  func.func @transform_3(%arg0: i32) -> (i32, i32) {
    %c0_i32 = arith.constant 0 : i32
    %c0_i32_0 = arith.constant 0 : i32
    return %arg0, %c0_i32 : i32, i32
  }
  func.func @transform_4(%arg0: i32) -> (i32, i32) {
    %c0_i32 = arith.constant 0 : i32
    %c0_i32_0 = arith.constant 0 : i32
    return %arg0, %c0_i32 : i32, i32
  }
}

</mosaic_0001>

<bundles_post_ra>
// kernel: tpu_custom_call.1
= control target key start
LH: loop header
LB: loop body
LE: loop exit
PB: predicated region body
PF: predicated region fallthrough
CT: control target
= control target key end

     0   :  { %s1150_s15 = smov 0   ;;  %s1444_s0 = inlined_call_operand.vmem [shape: f32[576,144], index: 0, kind: input, shape index: {}]   ;;  %s1445_s1 = inlined_call_operand.vmem [shape: f32[576,1], index: 1, kind: input, shape index: {}]   ;;  %s1446_s2 = inlined_call_operand.vmem [shape: f32[144,1], index: 2, kind: input, shape index: {}]   ;;  %s1447_s3 = inlined_call_operand.vmem [shape: f32[576,196], index: 3, kind: input, shape index: {}]   ;;  %s1448_s4 = inlined_call_operand.vmem [shape: f32[576,196], index: 4, kind: output, shape index: {}]  }
   0x1 LB: > { %s942_s16 = sadd.s32 4294967295, %s1121_s15   ;;  %p946_p0 = scmp.ge.s32.totalorder %s1121_s15, 1  ;;  %s1121_s15 = sphi %s1150_s15, %s14_s15  }
   0x2   : > { %p187_p1 = scmp.lt.s32.totalorder %s1121_s15, 5 }
   0x4   : > { %p188_p2 = pnand %p946_p0, %p187_p1 }
   0x5   : > { %s226_s13 = smul.u32 (!%p188_p2), 18, %s942_s16 }
   0x6   : > { %191 = sbr.rel (%p188_p2) target bundleno = 441 (0x1b9), region = 36 }
   0x7   : > { %p227_p3 = scmp.lt.s32.totalorder (!%p188_p2), %s226_s13, 71 }
   0xb   : > { %v268_v0 = vld [vmem:[%s1446_s2 + $0x78] sm:$0xff]  ;;  %v267_v1 = vld [vmem:[%s1446_s2 + $0x70] sm:$0xff]  ;;  %v266_v2 = vld [vmem:[%s1446_s2 + $0x68] sm:$0xff]  ;;  %v1123_v3 = vmov 0.0   ;;  %s1450_s13 = smov (!%p227_p3, %s226_s13), 71  ;;  %vm343_vm0 = vcmask 130048  }
   0xc   : > { %398 = vmatprep.subr.mxu0 %v1123_v3  ;;  %995 = vmatprep.subr.mxu1 %v1123_v3  ;;  %v286_v4 = vmax.f32 %v268_v0, 0.0  ;;  %v285_v5 = vmax.f32 %v267_v1, 0.0  ;;  %v265_v6 = vld [vmem:[%s1446_s2 + $0x60] sm:$0xff]  ;;  %v284_v7 = vmax.f32 %v266_v2, 0.0  ;;  %v264_v8 = vld [vmem:[%s1446_s2 + $0x58] sm:$0xff]  ;;  %v263_v10 = vld [vmem:[%s1446_s2 + $0x50] sm:$0xff] }
   0xd   : > { %v283_v9 = vmax.f32 %v265_v6, 0.0  ;;  %v282_v11 = vmax.f32 %v264_v8, 0.0  ;;  %v262_v12 = vld [vmem:[%s1446_s2 + $0x48] sm:$0xff]  ;;  %v281_v13 = vmax.f32 %v263_v10, 0.0  ;;  %v261_v14 = vld [vmem:[%s1446_s2 + $0x40] sm:$0xff]  ;;  %v260_v16 = vld [vmem:[%s1446_s2 + $0x38] sm:$0xff] }
   0xe   : > { %399 = vmatpush1.msra.mxu0 %v286_v4  ;;  %1013 = vmatpush1.msra.mxu1 %v286_v4  ;;  %v280_v15 = vmax.f32 %v262_v12, 0.0  ;;  %v279_v17 = vmax.f32 %v261_v14, 0.0  ;;  %v259_v18 = vld [vmem:[%s1446_s2 + $0x30] sm:$0xff]  ;;  %v278_v19 = vmax.f32 %v260_v16, 0.0  ;;  %v258_v20 = vld [vmem:[%s1446_s2 + $0x28] sm:$0xff]  ;;  %v257_v22 = vld [vmem:[%s1446_s2 + $0x20] sm:$0xff] }
   0xf   : > { %400 = vmatprep.subr.mxu0 %v1123_v3  ;;  %996 = vmatprep.subr.mxu1 %v1123_v3  ;;  %v277_v21 = vmax.f32 %v259_v18, 0.0  ;;  %v276_v23 = vmax.f32 %v258_v20, 0.0  ;;  %v256_v24 = vld [vmem:[%s1446_s2 + $0x18] sm:$0xff]  ;;  %v275_v25 = vmax.f32 %v257_v22, 0.0  ;;  %v255_v26 = vld [vmem:[%s1446_s2 + $0x10] sm:$0xff]  ;;  %v254_v28 = vld [vmem:[%s1446_s2 + $0x8] sm:$0xff] }
  0x10   : > { %401 = vmatpush1.msra.mxu0 %v285_v5  ;;  %1014 = vmatpush1.msra.mxu1 %v285_v5  ;;  %v274_v27 = vmax.f32 %v256_v24, 0.0  ;;  %v273_v29 = vmax.f32 %v255_v26, 0.0  ;;  %v253_v30 = vld [vmem:[%s1446_s2] sm:$0xff]  ;;  %v272_v31 = vmax.f32 %v254_v28, 0.0  ;;  %v270_v32 = vld [vmem:[%s1446_s2 + $0x88] sm:$0xff]  ;;  %s1242_s27 = sshll.u32 %s1450_s13, 4 }
  0x11   : > { %402 = vmatprep.subr.mxu0 %v1123_v3  ;;  %997 = vmatprep.subr.mxu1 %v1123_v3  ;;  %v271_v33 = vmax.f32 %v253_v30, 0.0  ;;  %v269_v34 = vld [vmem:[%s1446_s2 + $0x80] sm:$0xff]  ;;  %v288_v35 = vmax.f32 %v270_v32, 0.0  ;;  %s1255_s6 = scalar_lea.vmem %s1444_s0, %s1242_s27  ;;  %s949_s7 = sshll.u32 %s1450_s13, 3  ;;  %vm824_vm1 = vcmask 556032  }
  0x12   : > { %403 = vmatpush1.msra.mxu0 %v284_v7  ;;  %1015 = vmatpush1.msra.mxu1 %v284_v7  ;;  %v287_v36 = vmax.f32 %v269_v34, 0.0  ;;  %v290_v37 = vld [vmem:[%s1255_s6 + $0x8] sm:$0xff]  ;;  %v308_v38 = vld [vmem:[%s1255_s6 + $0x98] sm:$0xff]  ;;  %v289_v39 = vld [vmem:[%s1255_s6] sm:$0xff]  ;;  %s1319_s10 = scalar_lea.vmem %s1445_s1, %s949_s7  ;;  %s1343_s13 = scalar_lea.vmem %s1447_s3, %s1242_s27 }
  0x13   : > { %404 = vmatprep.subr.mxu0 %v1123_v3  ;;  %998 = vmatprep.subr.mxu1 %v1123_v3  ;;  %v307_v40 = vld [vmem:[%s1255_s6 + $0x90] sm:$0xff]  ;;  %v292_v41 = vld [vmem:[%s1255_s6 + $0x18] sm:$0xff]  ;;  %v310_v42 = vld [vmem:[%s1255_s6 + $0xa8] sm:$0xff]  ;;  %s1353_s18 = scalar_lea.vmem %s1448_s4, %s1242_s27 }
  0x14   : > { %405 = vmatpush1.msra.mxu0 %v283_v9  ;;  %1016 = vmatpush1.msra.mxu1 %v283_v9  ;;  %v291_v43 = vld [vmem:[%s1255_s6 + $0x10] sm:$0xff]  ;;  %v309_v44 = vld [vmem:[%s1255_s6 + $0xa0] sm:$0xff]  ;;  %v294_v45 = vld [vmem:[%s1255_s6 + $0x28] sm:$0xff]  ;;  %v1124_v9 = vmov 0  }
  0x15   : > { %406 = vmatprep.subr.mxu0 %v1123_v3  ;;  %999 = vmatprep.subr.mxu1 %v1123_v3  ;;  %v312_v46 = vld [vmem:[%s1255_s6 + $0xb8] sm:$0xff]  ;;  %v293_v47 = vld [vmem:[%s1255_s6 + $0x20] sm:$0xff]  ;;  %v311_v48 = vld [vmem:[%s1255_s6 + $0xb0] sm:$0xff] }
  0x16   : > { %407 = vmatpush1.msra.mxu0 %v282_v11  ;;  %1017 = vmatpush1.msra.mxu1 %v282_v11  ;;  %v296_v49 = vld [vmem:[%s1255_s6 + $0x38] sm:$0xff]  ;;  %v314_v50 = vld [vmem:[%s1255_s6 + $0xc8] sm:$0xff]  ;;  %v295_v51 = vld [vmem:[%s1255_s6 + $0x30] sm:$0xff] }
  0x17   : > { %408 = vmatprep.subr.mxu0 %v1123_v3  ;;  %1000 = vmatprep.subr.mxu1 %v1123_v3  ;;  %v313_v52 = vld [vmem:[%s1255_s6 + $0xc0] sm:$0xff]  ;;  %v298_v53 = vld [vmem:[%s1255_s6 + $0x48] sm:$0xff]  ;;  %v316_v54 = vld [vmem:[%s1255_s6 + $0xd8] sm:$0xff] }
  0x18   : > { %409 = vmatpush1.msra.mxu0 %v281_v13  ;;  %1018 = vmatpush1.msra.mxu1 %v281_v13  ;;  %v297_v55 = vld [vmem:[%s1255_s6 + $0x40] sm:$0xff]  ;;  %v315_v56 = vld [vmem:[%s1255_s6 + $0xd0] sm:$0xff]  ;;  %v300_v57 = vld [vmem:[%s1255_s6 + $0x58] sm:$0xff] }
  0x19   : > { %410 = vmatprep.subr.mxu0 %v1123_v3  ;;  %1001 = vmatprep.subr.mxu1 %v1123_v3  ;;  %v318_v58 = vld [vmem:[%s1255_s6 + $0xe8] sm:$0xff]  ;;  %v299_v59 = vld [vmem:[%s1255_s6 + $0x50] sm:$0xff]  ;;  %v317_v60 = vld [vmem:[%s1255_s6 + $0xe0] sm:$0xff] }
  0x1a   : > { %411 = vmatpush1.msra.mxu0 %v280_v15  ;;  %1019 = vmatpush1.msra.mxu1 %v280_v15  ;;  %v302_v61 = vld [vmem:[%s1255_s6 + $0x68] sm:$0xff]  ;;  %v320_v62 = vld [vmem:[%s1255_s6 + $0xf8] sm:$0xff]  ;;  %v301_v63 = vld [vmem:[%s1255_s6 + $0x60] sm:$0xff] }
  0x1b   : > { %412 = vmatprep.subr.mxu0 %v1123_v3  ;;  %1002 = vmatprep.subr.mxu1 %v1123_v3  ;;  %v319_v0 = vld [vmem:[%s1255_s6 + $0xf0] sm:$0xff]  ;;  %v304_v1 = vld [vmem:[%s1255_s6 + $0x78] sm:$0xff]  ;;  %v322_v2 = vld [vmem:[%s1255_s6 + $0x108] sm:$0xff] }
  0x1c   : > { %413 = vmatpush1.msra.mxu0 %v279_v17  ;;  %1020 = vmatpush1.msra.mxu1 %v279_v17  ;;  %v321_v4 = vld [vmem:[%s1255_s6 + $0x100] sm:$0xff]  ;;  %v306_v5 = vld [vmem:[%s1255_s6 + $0x88] sm:$0xff]  ;;  %v324_v6 = vld [vmem:[%s1255_s6 + $0x118] sm:$0xff] }
  0x1d   : > { %414 = vmatprep.subr.mxu0 %v1123_v3  ;;  %1003 = vmatprep.subr.mxu1 %v1123_v3  ;;  %v305_v7 = vld [vmem:[%s1255_s6 + $0x80] sm:$0xff]  ;;  %v323_v8 = vld [vmem:[%s1255_s6 + $0x110] sm:$0xff]  ;;  %v334_v11 = vld [vmem:[%s1319_s10 + $0x48] sm:$0xff] }
  0x1e   : > { %415 = vmatpush1.msra.mxu0 %v278_v19  ;;  %1021 = vmatpush1.msra.mxu1 %v278_v19  ;;  %v325_v10 = vld [vmem:[%s1319_s10] sm:$0xff]  ;;  %v326_v18 = vld [vmem:[%s1319_s10 + $0x8] sm:$0xff]  ;;  %v335_v19 = vld [vmem:[%s1319_s10 + $0x50] sm:$0xff] }
  0x1f   : > { %416 = vmatprep.subr.mxu0 %v1123_v3  ;;  %1004 = vmatprep.subr.mxu1 %v1123_v3  ;;  %v327_v28 = vld [vmem:[%s1319_s10 + $0x10] sm:$0xff] }
  0x20   : > { %417 = vmatpush1.msra.mxu0 %v277_v21  ;;  %1022 = vmatpush1.msra.mxu1 %v277_v21 }
  0x21   : > { %418 = vmatprep.subr.mxu0 %v1123_v3  ;;  %1005 = vmatprep.subr.mxu1 %v1123_v3 }
  0x22   : > { %419 = vmatpush1.msra.mxu0 %v276_v23  ;;  %1023 = vmatpush1.msra.mxu1 %v276_v23 }
  0x23   : > { %420 = vmatprep.subr.mxu0 %v1123_v3  ;;  %1006 = vmatprep.subr.mxu1 %v1123_v3 }
  0x24   : > { %421 = vmatpush1.msra.mxu0 %v275_v25  ;;  %1024 = vmatpush1.msra.mxu1 %v275_v25 }
  0x25   : > { %422 = vmatprep.subr.mxu0 %v1123_v3  ;;  %1007 = vmatprep.subr.mxu1 %v1123_v3 }
  0x26   : > { %423 = vmatpush1.msra.mxu0 %v274_v27  ;;  %1025 = vmatpush1.msra.mxu1 %v274_v27 }
  0x27   : > { %424 = vmatprep.subr.mxu0 %v1123_v3  ;;  %1008 = vmatprep.subr.mxu1 %v1123_v3 }
  0x28   : > { %425 = vmatpush1.msra.mxu0 %v273_v29  ;;  %1026 = vmatpush1.msra.mxu1 %v273_v29  ;;  %v336_v29 = vld [vmem:[%s1319_s10 + $0x58] sm:$0xff] }
  0x29   : > { %426 = vmatprep.subr.mxu0 %v1123_v3  ;;  %1009 = vmatprep.subr.mxu1 %v1123_v3 }
  0x2a   : > { %427 = vmatpush1.msra.mxu0 %v272_v31  ;;  %1027 = vmatpush1.msra.mxu1 %v272_v31 }
  0x2b   : > { %428 = vmatprep.subr.mxu0 %v1123_v3  ;;  %1010 = vmatprep.subr.mxu1 %v1123_v3 }
  0x2c   : > { %429 = vmatpush1.msra.mxu0 %v271_v33  ;;  %1028 = vmatpush1.msra.mxu1 %v271_v33 }
  0x2d   : > { %458 = vmatprep.subr.mxu0 %v1123_v3  ;;  %1011 = vmatprep.subr.mxu1 %v1123_v3 }
  0x2e   : > { %459 = vmatpush2.msra.mxu0 %v288_v35  ;;  %1029 = vmatpush2.msra.mxu1 %v288_v35 }
  0x2f   : > { %460 = vmatprep.subr.mxu0 %v1123_v3  ;;  %1012 = vmatprep.subr.mxu1 %v1123_v3  ;;  %v303_v3 = vld [vmem:[%s1255_s6 + $0x70] sm:$0xff] }
  0x30   : > { %461 = vmatpush2.msra.mxu0 %v287_v36  ;;  %1030 = vmatpush2.msra.mxu1 %v287_v36 }
  0x31   : > { %954 = vmatprep.mubr.msk.f32.mxu0 %vm343_vm0, %v290_v37  ;;  %963 = vmatprep.mubr.msk.f32.mxu1 %vm343_vm0, %v308_v38  ;;  %v328_v38 = vld [vmem:[%s1319_s10 + $0x18] sm:$0xff] }
  0x32   : > { %463 = vmatmul.mubr.f32.vlgmr.msra.gmra.mxu0 %v289_v39  ;;  %508 = vmatmul.mubr.f32.vlgmr.msra.gmra.mxu1 %v307_v40  ;;  %v337_v39 = vld [vmem:[%s1319_s10 + $0x60] sm:$0xff] }
  0x33   : > { %955 = vmatprep.mubr.msk.f32.mxu0 %vm343_vm0, %v292_v41  ;;  %964 = vmatprep.mubr.msk.f32.mxu1 %vm343_vm0, %v310_v42 }
  0x34   : > { %1041 = vset.pattern.permute.xlu0 %v1124_v9  ;;  %1042 = vset.pattern.permute.xlu1 %v1124_v9 }
  0x36   : > { %468 = vmatmul.mubr.f32.gmra.mxu0 %v291_v43  ;;  %513 = vmatmul.mubr.f32.gmra.mxu1 %v309_v44 }
  0x37   : > { %956 = vmatprep.mubr.msk.f32.mxu0 %vm343_vm0, %v294_v45  ;;  %965 = vmatprep.mubr.msk.f32.mxu1 %vm343_vm0, %v312_v46 }
  0x3a   : > { %473 = vmatmul.mubr.f32.gmra.mxu0 %v293_v47  ;;  %518 = vmatmul.mubr.f32.gmra.mxu1 %v311_v48  ;;  %v329_v48 = vld [vmem:[%s1319_s10 + $0x20] sm:$0xff] }
  0x3b   : > { %957 = vmatprep.mubr.msk.f32.mxu0 %vm343_vm0, %v296_v49  ;;  %966 = vmatprep.mubr.msk.f32.mxu1 %vm343_vm0, %v314_v50  ;;  %v338_v49 = vld [vmem:[%s1319_s10 + $0x68] sm:$0xff] }
  0x3e   : > { %478 = vmatmul.mubr.f32.gmra.mxu0 %v295_v51  ;;  %523 = vmatmul.mubr.f32.gmra.mxu1 %v313_v52 }
  0x3f   : > { %958 = vmatprep.mubr.msk.f32.mxu0 %vm343_vm0, %v298_v53  ;;  %967 = vmatprep.mubr.msk.f32.mxu1 %vm343_vm0, %v316_v54 }
  0x42   : > { %483 = vmatmul.mubr.f32.gmra.mxu0 %v297_v55  ;;  %528 = vmatmul.mubr.f32.gmra.mxu1 %v315_v56 }
  0x43   : > { %959 = vmatprep.mubr.msk.f32.mxu0 %vm343_vm0, %v300_v57  ;;  %968 = vmatprep.mubr.msk.f32.mxu1 %vm343_vm0, %v318_v58 }
  0x46   : > { %488 = vmatmul.mubr.f32.gmra.mxu0 %v299_v59  ;;  %533 = vmatmul.mubr.f32.gmra.mxu1 %v317_v60  ;;  %v330_v59 = vld [vmem:[%s1319_s10 + $0x28] sm:$0xff]  ;;  %v339_v60 = vld [vmem:[%s1319_s10 + $0x70] sm:$0xff] }
  0x47   : > { %960 = vmatprep.mubr.msk.f32.mxu0 %vm343_vm0, %v302_v61  ;;  %969 = vmatprep.mubr.msk.f32.mxu1 %vm343_vm0, %v320_v62 }
  0x4a   : > { %493 = vmatmul.mubr.f32.gmra.mxu0 %v301_v63  ;;  %538 = vmatmul.mubr.f32.gmra.mxu1 %v319_v0 }
  0x4b   : > { %961 = vmatprep.mubr.msk.f32.mxu0 %vm343_vm0, %v304_v1  ;;  %970 = vmatprep.mubr.msk.f32.mxu1 %vm343_vm0, %v322_v2 }
  0x4e   : > { %498 = vmatmul.mubr.f32.gmra.mxu0 %v303_v3  ;;  %543 = vmatmul.mubr.f32.gmra.mxu1 %v321_v4 }
  0x4f   : > { %962 = vmatprep.mubr.msk.f32.mxu0 %vm343_vm0, %v306_v5  ;;  %971 = vmatprep.mubr.msk.f32.mxu1 %vm343_vm0, %v324_v6 }
  0x52   : > { %503 = vmatmul.mubr.f32.gmra.mxu0 %v305_v7  ;;  %548 = vmatmul.mubr.f32.gmra.mxu1 %v323_v8  ;;  %v331_v8 = vld [vmem:[%s1319_s10 + $0x30] sm:$0xff] }
  0xf2   : > { %v464_v12 = vpop.f32.mrf.mxu0  ;;  %v509_v13 = vpop.f32.mrf.mxu1 }
  0xf3   : > { %v465_v14 = vadd.f32 %v464_v12, %v325_v10  ;;  %v510_v15 = vadd.f32 %v509_v13, %v334_v11  ;;  %v340_v10 = vld [vmem:[%s1319_s10 + $0x78] sm:$0xff] }
  0xf4   : > { %v466_v16 = vpop.f32.mrf.mxu0  ;;  %v511_v17 = vpop.f32.mrf.mxu1 }
  0xf5   : > { %v972_v20 = vmul.f32 -1.442695, %v465_v14  ;;  %v981_v21 = vmul.f32 -1.442695, %v510_v15 }
  0xf6   : > { %v469_v22 = vpop.f32.mrf.mxu0  ;;  %v514_v23 = vpop.f32.mrf.mxu1 }
  0xf7   : > { %1043 = vpow2.f32 %v972_v20  ;;  %v470_v24 = vadd.f32 %v469_v22, %v326_v18  ;;  %v515_v25 = vadd.f32 %v514_v23, %v335_v19  ;;  %v332_v22 = vld [vmem:[%s1319_s10 + $0x38] sm:$0xff] }
  0xf8   : > { %1045 = vpow2.f32 %v981_v21  ;;  %v471_v26 = vpop.f32.mrf.mxu0  ;;  %v516_v27 = vpop.f32.mrf.mxu1 }
  0xf9   : > { %v973_v30 = vmul.f32 -1.442695, %v470_v24  ;;  %v982_v31 = vmul.f32 -1.442695, %v515_v25  ;;  %v341_v24 = vld [vmem:[%s1319_s10 + $0x80] sm:$0xff] }
  0xfa   : > { %v474_v32 = vpop.f32.mrf.mxu0  ;;  %v519_v33 = vpop.f32.mrf.mxu1 }
  0xfb   : > { %1047 = vpow2.f32 %v973_v30  ;;  %v475_v34 = vadd.f32 %v474_v32, %v327_v28  ;;  %v520_v35 = vadd.f32 %v519_v33, %v336_v29 }
  0xfc   : > { %1049 = vpow2.f32 %v982_v31  ;;  %v476_v36 = vpop.f32.mrf.mxu0  ;;  %v521_v37 = vpop.f32.mrf.mxu1 }
  0xfd   : > { %v974_v40 = vmul.f32 -1.442695, %v475_v34  ;;  %v983_v41 = vmul.f32 -1.442695, %v520_v35  ;;  %v333_v36 = vld [vmem:[%s1319_s10 + $0x40] sm:$0xff] }
  0xfe   : > { %v479_v42 = vpop.f32.mrf.mxu0  ;;  %v524_v43 = vpop.f32.mrf.mxu1 }
  0xff   : > { %1051 = vpow2.f32 %v974_v40  ;;  %v480_v44 = vadd.f32 %v479_v42, %v328_v38  ;;  %v525_v45 = vadd.f32 %v524_v43, %v337_v39  ;;  %v342_v38 = vld [vmem:[%s1319_s10 + $0x88] sm:$0xff] }
 0x100   : > { %1053 = vpow2.f32 %v983_v41  ;;  %v481_v46 = vpop.f32.mrf.mxu0  ;;  %v526_v47 = vpop.f32.mrf.mxu1 }
 0x101   : > { %v975_v50 = vmul.f32 -1.442695, %v480_v44  ;;  %v984_v51 = vmul.f32 -1.442695, %v525_v45 }
 0x102   : > { %v484_v52 = vpop.f32.mrf.mxu0  ;;  %v529_v53 = vpop.f32.mrf.mxu1 }
 0x103   : > { %1055 = vpow2.f32 %v975_v50  ;;  %v485_v54 = vadd.f32 %v484_v52, %v329_v48  ;;  %v530_v55 = vadd.f32 %v529_v53, %v338_v49 }
 0x104   : > { %v1044_v56 = vpop.eup %1043  ;;  %1057 = vpow2.f32 %v984_v51  ;;  %v486_v57 = vpop.f32.mrf.mxu0 }
 0x105   : > { %v531_v58 = vpop.f32.mrf.mxu1  ;;  %v1046_v61 = vpop.eup %1045  ;;  %v607_v62 = vadd.f32 1.0, %v1044_v56  ;;  %v976_v63 = vmul.f32 -1.442695, %v485_v54  ;;  %v985_v1 = vmul.f32 -1.442695, %v530_v55 }
 0x106   : > { %v616_v0 = vadd.f32 1.0, %v1046_v61  ;;  %v489_v2 = vpop.f32.mrf.mxu0 }
 0x107   : > { %v534_v3 = vpop.f32.mrf.mxu1  ;;  %1059 = vrcp.f32 %v607_v62  ;;  %v490_v4 = vadd.f32 %v489_v2, %v330_v59 }
 0x108   : > { %v535_v5 = vadd.f32 %v534_v3, %v339_v60  ;;  %v1048_v6 = vpop.eup %1047  ;;  %1061 = vrcp.f32 %v616_v0  ;;  %v491_v7 = vpop.f32.mrf.mxu0 }
 0x109   : > { %v536_v9 = vpop.f32.mrf.mxu1  ;;  %v1050_v11 = vpop.eup %1049  ;;  %v608_v12 = vadd.f32 1.0, %v1048_v6  ;;  %1063 = vpow2.f32 %v976_v63  ;;  %v977_v13 = vmul.f32 -1.442695, %v490_v4 }
 0x10a   : > { %v617_v14 = vadd.f32 1.0, %v1050_v11  ;;  %1065 = vpow2.f32 %v985_v1  ;;  %v986_v15 = vmul.f32 -1.442695, %v535_v5  ;;  %v494_v16 = vpop.f32.mrf.mxu0 }
 0x10b   : > { %v539_v17 = vpop.f32.mrf.mxu1  ;;  %1067 = vrcp.f32 %v608_v12  ;;  %v495_v18 = vadd.f32 %v494_v16, %v331_v8 }
 0x10c   : > { %v540_v19 = vadd.f32 %v539_v17, %v340_v10  ;;  %v1052_v20 = vpop.eup %1051  ;;  %1069 = vrcp.f32 %v617_v14  ;;  %v496_v21 = vpop.f32.mrf.mxu0 }
 0x10d   : > { %v541_v23 = vpop.f32.mrf.mxu1  ;;  %v1054_v25 = vpop.eup %1053  ;;  %v609_v26 = vadd.f32 1.0, %v1052_v20  ;;  %1071 = vpow2.f32 %v977_v13  ;;  %v978_v27 = vmul.f32 -1.442695, %v495_v18 }
 0x10e   : > { %v618_v28 = vadd.f32 1.0, %v1054_v25  ;;  %1073 = vpow2.f32 %v986_v15  ;;  %v987_v29 = vmul.f32 -1.442695, %v540_v19  ;;  %v499_v30 = vpop.f32.mrf.mxu0 }
 0x10f   : > { %v544_v31 = vpop.f32.mrf.mxu1  ;;  %1075 = vrcp.f32 %v609_v26  ;;  %v500_v32 = vadd.f32 %v499_v30, %v332_v22  ;;  %v661_v26 = vld [vmem:[%s1343_s13] sm:$0xff] }
 0x110   : > { %v545_v33 = vadd.f32 %v544_v31, %v341_v24  ;;  %v1056_v34 = vpop.eup %1055  ;;  %1077 = vrcp.f32 %v618_v28  ;;  %v501_v35 = vpop.f32.mrf.mxu0  ;;  %v679_v28 = vld [vmem:[%s1343_s13 + $0x90] sm:$0xff] }
 0x111   : > { %v546_v37 = vpop.f32.mrf.mxu1  ;;  %v1058_v39 = vpop.eup %1057  ;;  %v610_v40 = vadd.f32 1.0, %v1056_v34  ;;  %1079 = vpow2.f32 %v978_v27  ;;  %v979_v41 = vmul.f32 -1.442695, %v500_v32  ;;  %v662_v27 = vld [vmem:[%s1343_s13 + $0x8] sm:$0xff] }
 0x112   : > { %v619_v42 = vadd.f32 1.0, %v1058_v39  ;;  %1081 = vpow2.f32 %v987_v29  ;;  %v988_v43 = vmul.f32 -1.442695, %v545_v33  ;;  %v504_v44 = vpop.f32.mrf.mxu0  ;;  %v680_v29 = vld [vmem:[%s1343_s13 + $0x98] sm:$0xff] }
 0x113   : > { %v549_v45 = vpop.f32.mrf.mxu1  ;;  %1083 = vrcp.f32 %v610_v40  ;;  %v505_v46 = vadd.f32 %v504_v44, %v333_v36  ;;  %v663_v36 = vld [vmem:[%s1343_s13 + $0x10] sm:$0xff]  ;;  %v664_v37 = vld [vmem:[%s1343_s13 + $0x18] sm:$0xff]  ;;  %v682_v44 = vld [vmem:[%s1343_s13 + $0xa8] sm:$0xff] }
 0x114   : > { %v550_v47 = vadd.f32 %v549_v45, %v342_v38  ;;  %v1060_v48 = vpop.eup %1059  ;;  %1085 = vrcp.f32 %v619_v42  ;;  %v506_v49 = vpop.f32.mrf.mxu0  ;;  %v666_v42 = vld [vmem:[%s1343_s13 + $0x28] sm:$0xff] }
 0x115   : > { %v551_v50 = vpop.f32.mrf.mxu1  ;;  %v1062_v51 = vpop.eup %1061  ;;  %1087 = vpow2.f32 %v979_v41  ;;  %v980_v52 = vmul.f32 -1.442695, %v505_v46  ;;  %699 = vperm.xlu0 %1041, %v1060_v48   ;;  %v665_v41 = vld [vmem:[%s1343_s13 + $0x20] sm:$0xff] }
 0x116   : > { %v989_v53 = vmul.f32 -1.442695, %v550_v47  ;;  %v1064_v54 = vpop.eup %1063  ;;  %1089 = vpow2.f32 %v988_v43  ;;  %744 = vperm.xlu1 %1042, %v1062_v51   ;;  %v681_v43 = vld [vmem:[%s1343_s13 + $0xa0] sm:$0xff]  ;;  %v683_v51 = vld [vmem:[%s1343_s13 + $0xb0] sm:$0xff] }
 0x117   : > { %v1066_v55 = vpop.eup %1065  ;;  %v611_v56 = vadd.f32 1.0, %v1064_v54  ;;  %1091 = vpow2.f32 %v980_v52  ;;  %v684_v52 = vld [vmem:[%s1343_s13 + $0xb8] sm:$0xff]  ;;  %v686_v54 = vld [vmem:[%s1343_s13 + $0xc8] sm:$0xff] }
 0x118   : > { %v1068_v57 = vpop.eup %1067  ;;  %v620_v58 = vadd.f32 1.0, %v1066_v55  ;;  %1093 = vpow2.f32 %v989_v53  ;;  %v685_v53 = vld [vmem:[%s1343_s13 + $0xc0] sm:$0xff] }
 0x119   : > { %v1070_v59 = vpop.eup %1069  ;;  %1095 = vrcp.f32 %v611_v56  ;;  %704 = vperm.xlu0 %1041, %v1068_v57  }
 0x11a   : > { %v1072_v60 = vpop.eup %1071  ;;  %1097 = vrcp.f32 %v620_v58 }
 0x11b   : > { %v1074_v61 = vpop.eup %1073  ;;  %v612_v62 = vadd.f32 1.0, %v1072_v60 }
 0x11c   : > { %v1076_v63 = vpop.eup %1075  ;;  %v621_v0 = vadd.f32 1.0, %v1074_v61  ;;  %v667_v61 = vld [vmem:[%s1343_s13 + $0x30] sm:$0xff] }
 0x11d   : > { %v1078_v1 = vpop.eup %1077  ;;  %709 = vperm.xlu1 %1042, %v1076_v63   ;;  %749 = vperm.xlu0 %1041, %v1070_v59  }
 0x11e   : > { %v1080_v2 = vpop.eup %1079  ;;  %1099 = vrcp.f32 %v621_v0  ;;  %v669_v0 = vld [vmem:[%s1343_s13 + $0x40] sm:$0xff] }
 0x11f   : > { %v1082_v3 = vpop.eup %1081  ;;  %1101 = vrcp.f32 %v612_v62  ;;  %v613_v4 = vadd.f32 1.0, %v1080_v2  ;;  %v668_v62 = vld [vmem:[%s1343_s13 + $0x38] sm:$0xff] }
 0x120   : > { %v1084_v5 = vpop.eup %1083  ;;  %v622_v6 = vadd.f32 1.0, %v1082_v3 }
 0x121   : > { %v1086_v7 = vpop.eup %1085  ;;  %1103 = vrcp.f32 %v613_v4  ;;  %754 = vperm.xlu1 %1042, %v1078_v1   ;;  %v670_v1 = vld [vmem:[%s1343_s13 + $0x48] sm:$0xff] }
 0x122   : > { %v1088_v8 = vpop.eup %1087  ;;  %1105 = vrcp.f32 %v622_v6  ;;  %759 = vperm.xlu0 %1041, %v1086_v7   ;;  %v688_v6 = vld [vmem:[%s1343_s13 + $0xd8] sm:$0xff] }
 0x123   : > { %v1090_v9 = vpop.eup %1089  ;;  %v614_v10 = vadd.f32 1.0, %v1088_v8 }
 0x124   : > { %v1092_v11 = vpop.eup %1091  ;;  %v623_v17 = vadd.f32 1.0, %v1090_v9 }
 0x125   : > { %v1094_v12 = vpop.eup %1093  ;;  %v615_v13 = vadd.f32 1.0, %v1092_v11  ;;  %714 = vperm.xlu1 %1042, %v1084_v5   ;;  %1107 = vrcp.f32 %v614_v10  ;;  %v687_v5 = vld [vmem:[%s1343_s13 + $0xd0] sm:$0xff] }
 0x126   : > { %v1096_v14 = vpop.eup %1095  ;;  %v624_v15 = vadd.f32 1.0, %v1094_v12  ;;  %v689_v12 = vld [vmem:[%s1343_s13 + $0xe0] sm:$0xff] }
 0x127   : > { %v1098_v16 = vpop.eup %1097  ;;  %1109 = vrcp.f32 %v615_v13  ;;  %719 = vperm.xlu0 %1041, %v1096_v14   ;;  %v690_v13 = vld [vmem:[%s1343_s13 + $0xe8] sm:$0xff]  ;;  %v671_v14 = vld [vmem:[%s1343_s13 + $0x50] sm:$0xff] }
 0x128   : > { %1111 = vrcp.f32 %v624_v15  ;;  %v672_v15 = vld [vmem:[%s1343_s13 + $0x58] sm:$0xff] }
 0x129   : > { %764 = vperm.xlu1 %1042, %v1098_v16   ;;  %1113 = vrcp.f32 %v623_v17 }
 0x12b   : > { %v1100_v18 = vpop.eup %1099 }
 0x12c   : > { %v1102_v19 = vpop.eup %1101  ;;  %769 = vperm.xlu0 %1041, %v1100_v18  }
 0x12d   : > { %724 = vperm.xlu1 %1042, %v1102_v19  }
 0x12e   : > { %v1104_v20 = vpop.eup %1103 }
 0x12f   : > { %v1106_v21 = vpop.eup %1105 }
 0x130   : > { %729 = vperm.xlu0 %1041, %v1104_v20  }
 0x131   : > { %774 = vperm.xlu1 %1042, %v1106_v21  }
 0x132   : > { %v1108_v22 = vpop.eup %1107 }
 0x134   : > { %v1110_v23 = vpop.eup %1109 }
 0x135   : > { %734 = vperm.xlu1 %1042, %v1108_v22   ;;  %739 = vperm.xlu0 %1041, %v1110_v23   ;;  %v1112_v24 = vpop.eup %1111  ;;  %v673_v22 = vld [vmem:[%s1343_s13 + $0x60] sm:$0xff]  ;;  %v674_v23 = vld [vmem:[%s1343_s13 + $0x68] sm:$0xff] }
 0x136   : > { %v1114_v25 = vpop.eup %1113 }
 0x139   : > { %784 = vperm.xlu1 %1042, %v1112_v24   ;;  %779 = vperm.xlu0 %1041, %v1114_v25   ;;  %v691_v24 = vld [vmem:[%s1343_s13 + $0xf0] sm:$0xff]  ;;  %v692_v25 = vld [vmem:[%s1343_s13 + $0xf8] sm:$0xff] }
 0x190   : > { %v700_v30 = vpop.permute.xlu0 %699 }
 0x191   : > { %v787_v31 = vmul.f32 %v700_v30, %v661_v26  ;;  %v788_v32 = vmul.f32 %v700_v30, %v662_v27  ;;  %v745_v33 = vpop.permute.xlu1 %744 }
 0x192   : > { %v805_v34 = vmul.f32 %v745_v33, %v679_v28  ;;  %v806_v35 = vmul.f32 %v745_v33, %v680_v29  ;;  %v676_v33 = vld [vmem:[%s1343_s13 + $0x78] sm:$0xff] }
 0x193   : > { %823 = vst [vmem:[%s1353_s18] sm:$0xff] %v787_v31  ;;  %825 = vst.msk [vmem:[%s1353_s18 + $0x8] sm:$0xff] %vm824_vm1, %v788_v32  ;;  %v675_v32 = vld [vmem:[%s1343_s13 + $0x70] sm:$0xff] }
 0x194   : > { %842 = vst [vmem:[%s1353_s18 + $0x90] sm:$0xff] %v805_v34  ;;  %843 = vst.msk [vmem:[%s1353_s18 + $0x98] sm:$0xff] %vm824_vm1, %v806_v35  ;;  %v705_v38 = vpop.permute.xlu0 %704  ;;  %v677_v34 = vld [vmem:[%s1343_s13 + $0x80] sm:$0xff]  ;;  %v678_v35 = vld [vmem:[%s1343_s13 + $0x88] sm:$0xff] }
 0x195   : > { %v789_v39 = vmul.f32 %v705_v38, %v663_v36  ;;  %v790_v40 = vmul.f32 %v705_v38, %v664_v37 }
 0x197   : > { %826 = vst [vmem:[%s1353_s18 + $0x10] sm:$0xff] %v789_v39  ;;  %827 = vst.msk [vmem:[%s1353_s18 + $0x18] sm:$0xff] %vm824_vm1, %v790_v40 }
 0x198   : > { %v710_v45 = vpop.permute.xlu1 %709  ;;  %v750_v46 = vpop.permute.xlu0 %749 }
 0x199   : > { %v791_v47 = vmul.f32 %v710_v45, %v665_v41  ;;  %v792_v48 = vmul.f32 %v710_v45, %v666_v42  ;;  %v807_v49 = vmul.f32 %v750_v46, %v681_v43  ;;  %v808_v50 = vmul.f32 %v750_v46, %v682_v44  ;;  %v695_v42 = vld [vmem:[%s1343_s13 + $0x110] sm:$0xff]  ;;  %v696_v43 = vld [vmem:[%s1343_s13 + $0x118] sm:$0xff]  ;;  %v693_v44 = vld [vmem:[%s1343_s13 + $0x100] sm:$0xff] }
 0x19a   : > { %v694_v45 = vld [vmem:[%s1343_s13 + $0x108] sm:$0xff] }
 0x19b   : > { %828 = vst [vmem:[%s1353_s18 + $0x20] sm:$0xff] %v791_v47  ;;  %829 = vst.msk [vmem:[%s1353_s18 + $0x28] sm:$0xff] %vm824_vm1, %v792_v48 }
 0x19c   : > { %844 = vst [vmem:[%s1353_s18 + $0xa0] sm:$0xff] %v807_v49  ;;  %845 = vst.msk [vmem:[%s1353_s18 + $0xa8] sm:$0xff] %vm824_vm1, %v808_v50  ;;  %v755_v55 = vpop.permute.xlu1 %754 }
 0x19d   : > { %v809_v56 = vmul.f32 %v755_v55, %v683_v51  ;;  %v810_v57 = vmul.f32 %v755_v55, %v684_v52  ;;  %v760_v58 = vpop.permute.xlu0 %759 }
 0x19e   : > { %v811_v59 = vmul.f32 %v760_v58, %v685_v53  ;;  %v812_v60 = vmul.f32 %v760_v58, %v686_v54 }
 0x19f   : > { %846 = vst [vmem:[%s1353_s18 + $0xb0] sm:$0xff] %v809_v56  ;;  %847 = vst.msk [vmem:[%s1353_s18 + $0xb8] sm:$0xff] %vm824_vm1, %v810_v57 }
 0x1a0   : > { %848 = vst [vmem:[%s1353_s18 + $0xc0] sm:$0xff] %v811_v59  ;;  %849 = vst.msk [vmem:[%s1353_s18 + $0xc8] sm:$0xff] %vm824_vm1, %v812_v60  ;;  %v715_v63 = vpop.permute.xlu1 %714 }
 0x1a1   : > { %v793_v2 = vmul.f32 %v715_v63, %v667_v61  ;;  %v794_v3 = vmul.f32 %v715_v63, %v668_v62 }
 0x1a2   : > { %v720_v4 = vpop.permute.xlu0 %719 }
 0x1a3   : > { %830 = vst [vmem:[%s1353_s18 + $0x30] sm:$0xff] %v793_v2  ;;  %831 = vst.msk [vmem:[%s1353_s18 + $0x38] sm:$0xff] %vm824_vm1, %v794_v3  ;;  %v795_v7 = vmul.f32 %v720_v4, %v669_v0  ;;  %v796_v8 = vmul.f32 %v720_v4, %v670_v1 }
 0x1a4   : > { %v765_v9 = vpop.permute.xlu1 %764 }
 0x1a5   : > { %832 = vst [vmem:[%s1353_s18 + $0x40] sm:$0xff] %v795_v7  ;;  %833 = vst.msk [vmem:[%s1353_s18 + $0x48] sm:$0xff] %vm824_vm1, %v796_v8  ;;  %v813_v10 = vmul.f32 %v765_v9, %v687_v5  ;;  %v814_v11 = vmul.f32 %v765_v9, %v688_v6 }
 0x1a7   : > { %850 = vst [vmem:[%s1353_s18 + $0xd0] sm:$0xff] %v813_v10  ;;  %851 = vst.msk [vmem:[%s1353_s18 + $0xd8] sm:$0xff] %vm824_vm1, %v814_v11  ;;  %v770_v16 = vpop.permute.xlu0 %769 }
 0x1a8   : > { %v815_v17 = vmul.f32 %v770_v16, %v689_v12  ;;  %v816_v18 = vmul.f32 %v770_v16, %v690_v13  ;;  %v725_v19 = vpop.permute.xlu1 %724 }
 0x1a9   : > { %v797_v20 = vmul.f32 %v725_v19, %v671_v14  ;;  %v798_v21 = vmul.f32 %v725_v19, %v672_v15 }
 0x1aa   : > { %852 = vst [vmem:[%s1353_s18 + $0xe0] sm:$0xff] %v815_v17  ;;  %853 = vst.msk [vmem:[%s1353_s18 + $0xe8] sm:$0xff] %vm824_vm1, %v816_v18 }
 0x1ab   : > { %834 = vst [vmem:[%s1353_s18 + $0x50] sm:$0xff] %v797_v20  ;;  %835 = vst.msk [vmem:[%s1353_s18 + $0x58] sm:$0xff] %vm824_vm1, %v798_v21  ;;  %v730_v26 = vpop.permute.xlu0 %729 }
 0x1ac   : > { %v799_v27 = vmul.f32 %v730_v26, %v673_v22  ;;  %v800_v28 = vmul.f32 %v730_v26, %v674_v23  ;;  %v775_v29 = vpop.permute.xlu1 %774 }
 0x1ad   : > { %v817_v30 = vmul.f32 %v775_v29, %v691_v24  ;;  %v818_v31 = vmul.f32 %v775_v29, %v692_v25 }
 0x1ae   : > { %836 = vst [vmem:[%s1353_s18 + $0x60] sm:$0xff] %v799_v27  ;;  %837 = vst.msk [vmem:[%s1353_s18 + $0x68] sm:$0xff] %vm824_vm1, %v800_v28 }
 0x1af   : > { %854 = vst [vmem:[%s1353_s18 + $0xf0] sm:$0xff] %v817_v30  ;;  %855 = vst.msk [vmem:[%s1353_s18 + $0xf8] sm:$0xff] %vm824_vm1, %v818_v31 }
 0x1b0   : > { %v735_v36 = vpop.permute.xlu1 %734  ;;  %v740_v37 = vpop.permute.xlu0 %739 }
 0x1b1   : > { %v801_v38 = vmul.f32 %v735_v36, %v675_v32  ;;  %v802_v39 = vmul.f32 %v735_v36, %v676_v33  ;;  %v803_v40 = vmul.f32 %v740_v37, %v677_v34  ;;  %v804_v41 = vmul.f32 %v740_v37, %v678_v35 }
 0x1b3   : > { %838 = vst [vmem:[%s1353_s18 + $0x70] sm:$0xff] %v801_v38  ;;  %839 = vst.msk [vmem:[%s1353_s18 + $0x78] sm:$0xff] %vm824_vm1, %v802_v39 }
 0x1b4   : > { %840 = vst [vmem:[%s1353_s18 + $0x80] sm:$0xff] %v803_v40  ;;  %841 = vst.msk [vmem:[%s1353_s18 + $0x88] sm:$0xff] %vm824_vm1, %v804_v41  ;;  %v785_v46 = vpop.permute.xlu1 %784  ;;  %v780_v47 = vpop.permute.xlu0 %779 }
 0x1b5   : > { %v821_v48 = vmul.f32 %v785_v46, %v695_v42  ;;  %v822_v49 = vmul.f32 %v785_v46, %v696_v43  ;;  %v819_v50 = vmul.f32 %v780_v47, %v693_v44  ;;  %v820_v51 = vmul.f32 %v780_v47, %v694_v45 }
 0x1b7   : > { %858 = vst [vmem:[%s1353_s18 + $0x110] sm:$0xff] %v821_v48  ;;  %859 = vst.msk [vmem:[%s1353_s18 + $0x118] sm:$0xff] %vm824_vm1, %v822_v49 }
 0x1b8   : > { %856 = vst [vmem:[%s1353_s18 + $0x100] sm:$0xff] %v819_v50  ;;  %857 = vst.msk [vmem:[%s1353_s18 + $0x108] sm:$0xff] %vm824_vm1, %v820_v51 }
 0x1b9 PF: > { %s14_s15 = sadd.s32 1, %s1121_s15  }
 0x1ba   : > { %p11_p4 = scmp.ge.s32.totalorder %s14_s15, 6  }
 0x1bc   :  { %13 = sbr.rel (!%p11_p4) target bundleno = 1 (0x1), region = 72 }

</bundles_post_ra>
